<compile_context>
chip_gen: v7x
topology: tpu7x:2x2x1
jax: 0.10.0
libtpu: 0.0.40
codegen_flags: <defaults>
</compile_context>

<pallas_src>
import functools

import jax
import jax.numpy as jnp
from jax.experimental import pallas as pl
from jax.experimental.pallas import tpu as pltpu

_VMEM_LIMIT_BYTES = 48 * 1024 * 1024   # below physical VMEM on v5e/v6e/v7x


def _round_up(x, m):
    return (x + m - 1) // m * m


def pixel_shuffle(x, r):
    # PyTorch nn.PixelShuffle semantics on NCHW input (thin XLA glue).
    b, c, h, w = x.shape
    co = c // (r * r)
    x = x.reshape(b, co, r, r, h, w)
    x = x.transpose(0, 1, 4, 2, 5, 3)
    return x.reshape(b, co, h * r, w * r)


def _default_target_lanes():
    # Bigger tiles amortize per-grid-step overhead; cap lower on v7x (64 MiB VMEM,
    # 3.2 TB/s HBM) than on v5e/v6e (128 MiB).
    try:
        vmem = pltpu.get_tpu_info().vmem_capacity_bytes
        return 32768 if vmem <= (64 << 20) else 65536
    except Exception:
        return 32768


def _pick_block_rows(H, W, target_lanes):
    """Largest TH | H with TH*W <= target_lanes and TH*W a multiple of 128.

    Falls back to the smallest lane-aligned divisor if none fits the target
    (so a missing divisor never silently produces an oversized tile)."""
    if H * W <= target_lanes:
        return H
    divs = [th for th in range(1, H + 1) if H % th == 0]
    aligned = [th for th in divs if (th * W) % 128 == 0]
    fit = [th for th in aligned if th * W <= target_lanes]
    if fit:
        return max(fit)
    if aligned:
        return min(aligned)
    return H


# ---------- pass 1: conv3x3 (3 bf16 matmuls + f32 lane rolls) + BN partials ----
def _conv_stats_kernel(x_ref, w_ref, lmask_ref, rmask_ref, y_ref, stats_ref):
    x = x_ref[0]                                   # (3*Cin, TM) bf16, dy taps stacked
    kc = x.shape[0]
    tm = x.shape[1]
    w = w_ref[...]                                 # (cpad, 9*Cin) bf16

    # One MXU matmul per kw tap on the *unshifted* input; the +-1 horizontal
    # shift commutes with the sublane contraction, so it is applied to the f32
    # result with an XLU lane rotation + precomputed row-boundary masks.
    # No conv bias: a per-channel constant cancels through train-mode BatchNorm.
    y0 = jnp.dot(w[:, 0:kc], x, preferred_element_type=jnp.float32)
    y1 = jnp.dot(w[:, kc:2 * kc], x, preferred_element_type=jnp.float32)
    y2 = jnp.dot(w[:, 2 * kc:3 * kc], x, preferred_element_type=jnp.float32)
    y = (lmask_ref[...] * pltpu.roll(y0, shift=1, axis=1)
         + y1
         + rmask_ref[...] * pltpu.roll(y2, shift=tm - 1, axis=1))

    # Per-channel partial sums for the global (train-mode) BatchNorm statistics,
    # taken from the f32 accumulator *before* the bf16 downcast.  One contiguous
    # zero-filled 128-lane store (no masked width-1 stores, no stale lanes).
    s1 = jnp.sum(y, axis=1, keepdims=True)
    s2 = jnp.sum(y * y, axis=1, keepdims=True)
    stats_ref[...] = jnp.concatenate(
        [s1, s2, jnp.zeros((s1.shape[0], 126), jnp.float32)], axis=1)

    y_ref[0] = y.astype(y_ref.dtype)               # bf16 intermediate to HBM


# ---------- pass 2: BN + ReLU + partial SE pool -------------------------------
def _bn_pool_kernel(y_ref, bn_ref, pool_ref):
    y = y_ref[0].astype(jnp.float32)               # (cpad, TM)
    z = jnp.maximum(y * bn_ref[:, 0:1] + bn_ref[:, 1:2], 0.0)
    s = jnp.sum(z, axis=1, keepdims=True)
    pool_ref[...] = jnp.concatenate(
        [s, jnp.zeros((s.shape[0], 127), jnp.float32)], axis=1)


# ---------- pass 3: BN + ReLU + per-batch SE rescale --------------------------
def _bn_se_scale_kernel(y_ref, bn_ref, s_ref, o_ref, *, cout):
    y = y_ref[0].astype(jnp.float32)               # (cpad, TM)
    z = jnp.maximum(y * bn_ref[:, 0:1] + bn_ref[:, 1:2], 0.0)
    out = z * s_ref[0]                             # (cpad, TM) * (cpad, 1)
    if cout != out.shape[0]:
        out = out[:cout]
    o_ref[0] = out.astype(o_ref.dtype)


def enhanced_psd_forward(x, params, upscale_factor=2, eps=1e-5,
                         block_rows=None, target_lanes=None):
    wconv = params["conv_w"]     # (Cout, Cin, 3, 3)  PyTorch OIHW
    gamma = params["bn_gamma"]   # (Cout,)
    beta = params["bn_beta"]     # (Cout,)
    w1 = params["se_w1"]         # (Cr, Cout)
    w2 = params["se_w2"]         # (Cout, Cr)
    # NOTE: params["conv_b"] is intentionally unused in the kernel path — a
    # per-channel constant shift cancels exactly through train-mode BatchNorm.

    xs = pixel_shuffle(x, upscale_factor)          # (B, Cin, H, W)
    B, cin, H, W = xs.shape
    cout = wconv.shape[0]
    cpad = _round_up(cout, 16)                     # bf16 sublane tile is (16, 128)
    M = H * W

    if target_lanes is None:
        target_lanes = _default_target_lanes()
    if block_rows is None:
        block_rows = _pick_block_rows(H, W, target_lanes)
    TH = block_rows
    assert H % TH == 0
    TM = TH * W
    assert TM == M or TM % 128 == 0, "row tile must be lane aligned"
    HC = H // TH
    G = B * HC          # keep >= 2 (ideally even) so v7x megacore is balanced
    kc = 3 * cin

    cparams = pltpu.CompilerParams(
        dimension_semantics=("parallel", "parallel"),
        vmem_limit_bytes=_VMEM_LIMIT_BYTES)

    # --- glue: vertical (dy) tap stack, flattened pixel axis, bf16 -------------
    xpad = jnp.pad(xs, ((0, 0), (0, 0), (1, 1), (0, 0)))
    xv = jnp.concatenate(
        [xpad[:, :, 0:H, :], xpad[:, :, 1:H + 1, :], xpad[:, :, 2:H + 2, :]],
        axis=1)                                     # (B, 3Cin, H, W)
    xf = xv.reshape(B, kc, M).astype(jnp.bfloat16)

    # grid-invariant row-boundary masks for the +-1 lane rolls (hoisted)
    wpos = jnp.arange(TM, dtype=jnp.int32) % W
    lmask = (wpos != 0).astype(jnp.float32).reshape(1, TM)
    rmask = (wpos != W - 1).astype(jnp.float32).reshape(1, TM)

    # conv weight (Cout, Cin, kh, kw) -> (cpad, 9*Cin), col = kw*3Cin + kh*Cin + c
    w_flat = jnp.transpose(wconv, (0, 3, 2, 1)).reshape(cout, 9 * cin)
    w_mat = jnp.zeros((cpad, 9 * cin), jnp.float32).at[:cout].set(w_flat)
    w_mat = w_mat.astype(jnp.bfloat16)

    # ---------------- pass 1: conv + partial BN stats (y stored bf16) ----------
    y, stats = pl.pallas_call(
        _conv_stats_kernel,
        out_shape=(jax.ShapeDtypeStruct((B, cpad, M), jnp.bfloat16),
                   jax.ShapeDtypeStruct((cpad, G * 128), jnp.float32)),
        grid_spec=pltpu.PrefetchScalarGridSpec(
            num_scalar_prefetch=0,
            grid=(B, HC),
            in_specs=[
                pl.BlockSpec((1, kc, TM), lambda b, h: (b, 0, h)),
                pl.BlockSpec((cpad, 9 * cin), lambda b, h: (0, 0)),
                pl.BlockSpec((1, TM), lambda b, h: (0, 0)),
                pl.BlockSpec((1, TM), lambda b, h: (0, 0)),
            ],
            out_specs=(
                pl.BlockSpec((1, cpad, TM), lambda b, h: (b, 0, h)),
                pl.BlockSpec((cpad, 128), lambda b, h: (0, b * HC + h)),
            ),
        ),
        compiler_params=cparams,
    )(xf, w_mat, lmask, rmask)

    # --- glue: finalize global batch stats, fold into one scale/shift ----------
    st = stats.reshape(cpad, B, HC, 128)
    n = float(B * M)
    mean = jnp.sum(st[..., 0], axis=(1, 2)) / n
    # TODO(synk): E[y^2]-E[y]^2 can cancel catastrophically for very large
    # activations; switch to mean-shifted per-tile partials if that matters.
    var = jnp.maximum(jnp.sum(st[..., 1], axis=(1, 2)) / n - mean * mean, 0.0)
    gamma_p = jnp.zeros((cpad,), jnp.float32).at[:cout].set(gamma)
    beta_p = jnp.zeros((cpad,), jnp.float32).at[:cout].set(beta)
    scale = gamma_p * jax.lax.rsqrt(var + eps)
    shift = beta_p - mean * scale
    bn_par = jnp.stack([scale, shift], axis=1)      # (cpad, 2) f32

    # ---------------- pass 2: BN + ReLU + partial SE pools ---------------------
    pools = pl.pallas_call(
        _bn_pool_kernel,
        out_shape=jax.ShapeDtypeStruct((cpad, G * 128), jnp.float32),
        grid_spec=pltpu.PrefetchScalarGridSpec(
            num_scalar_prefetch=0,
            grid=(B, HC),
            in_specs=[
                pl.BlockSpec((1, cpad, TM), lambda b, h: (b, 0, h)),
                pl.BlockSpec((cpad, 2), lambda b, h: (0, 0)),
            ],
            out_specs=pl.BlockSpec((cpad, 128), lambda b, h: (0, b * HC + h)),
        ),
        compiler_params=cparams,
    )(y, bn_par)

    # --- glue: SE excitation (B x Cout sized) hoisted out of the kernels --------
    pool = pools.reshape(cpad, B, HC, 128)[..., 0].sum(axis=2) / float(M)  # (cpad, B)
    pool_b = jnp.transpose(pool, (1, 0))[:, :cout]                         # (B, cout)
    hid = jnp.maximum(pool_b @ w1.T, 0.0)                                  # (B, Cr)
    se = jax.nn.sigmoid(hid @ w2.T)                                        # (B, cout)
    se_col = jnp.zeros((B, cpad), jnp.float32).at[:, :cout].set(se).reshape(B, cpad, 1)

    # ---------------- pass 3: BN + ReLU + per-batch SE rescale -> output -------
    # Output is emitted in bf16 (deliberate precision trade; halves the final
    # HBM write and avoids the cpad->cout slice copy).
    out = pl.pallas_call(
        functools.partial(_bn_se_scale_kernel, cout=cout),
        out_shape=jax.ShapeDtypeStruct((B, cout, M), jnp.bfloat16),
        grid_spec=pltpu.PrefetchScalarGridSpec(
            num_scalar_prefetch=0,
            grid=(B, HC),
            in_specs=[
                pl.BlockSpec((1, cpad, TM), lambda b, h: (b, 0, h)),
                pl.BlockSpec((cpad, 2), lambda b, h: (0, 0)),
                pl.BlockSpec((1, cpad, 1), lambda b, h: (b, 0, 0)),
            ],
            out_specs=pl.BlockSpec((1, cout, TM), lambda b, h: (b, 0, h)),
        ),
        compiler_params=cparams,
    )(y, bn_par, se_col)

    return out.reshape(B, cout, H, W)


def reference_forward(x, params, upscale_factor=2, eps=1e-5):
    # Pure-JAX reference (same semantics as the PyTorch module) for correctness.
    xs = pixel_shuffle(x, upscale_factor)
    y = jax.lax.conv_general_dilated(
        xs, params["conv_w"], window_strides=(1, 1), padding="SAME",
        dimension_numbers=("NCHW", "OIHW", "NCHW"))
    y = y + params["conv_b"][None, :, None, None]
    mean = y.mean(axis=(0, 2, 3), keepdims=True)
    var = y.var(axis=(0, 2, 3), keepdims=True)       # biased (train-mode BN)
    y = (y - mean) / jnp.sqrt(var + eps)
    y = y * params["bn_gamma"][None, :, None, None] + params["bn_beta"][None, :, None, None]
    y = jnp.maximum(y, 0.0)
    pool = y.mean(axis=(2, 3))                       # (B, Cout)
    h = jnp.maximum(pool @ params["se_w1"].T, 0.0)
    s = jax.nn.sigmoid(h @ params["se_w2"].T)
    return y * s[:, :, None, None]


if __name__ == "__main__":
    key = jax.random.PRNGKey(0)
    B, in_ch, H0, W0 = 2, 16, 8, 8
    out_ch, r = 32, 2
    cin = in_ch // (r * r)      # 4
    cr = out_ch // 16           # SE reduction=16 -> 2

    ks = jax.random.split(key, 7)
    x = jax.random.normal(ks[0], (B, in_ch, H0, W0), jnp.float32)
    params = {
        "conv_w": 0.1 * jax.random.normal(ks[1], (out_ch, cin, 3, 3), jnp.float32),
        "conv_b": 0.1 * jax.random.normal(ks[2], (out_ch,), jnp.float32),
        "bn_gamma": 1.0 + 0.1 * jax.random.normal(ks[3], (out_ch,), jnp.float32),
        "bn_beta": 0.1 * jax.random.normal(ks[4], (out_ch,), jnp.float32),
        "se_w1": 0.2 * jax.random.normal(ks[5], (cr, out_ch), jnp.float32),
        "se_w2": 0.2 * jax.random.normal(ks[6], (out_ch, cr), jnp.float32),
    }

    # block_rows=8 -> 2 H-chunks per image: exercises the tiled / multi-step path
    # and keeps the grid (2, 2) even for v7x megacore.
    out = enhanced_psd_forward(x, params, upscale_factor=r, block_rows=8)
    out = jax.block_until_ready(out)

    assert out.shape == (B, out_ch, H0 * r, W0 * r), out.shape
    out32 = out.astype(jnp.float32)
    assert bool(jnp.all(jnp.isfinite(out32)))
    ref = reference_forward(x, params, upscale_factor=r)
    err = float(jnp.max(jnp.abs(out32 - ref)))
    assert bool(jnp.allclose(out32, ref, rtol=2e-2, atol=2e-2)), err
    print("KERNEL_OK")
</pallas_src>

<mosaic_0001>
module attributes {stable_mosaic.version = 11 : i64} {
  func.func @_conv_stats_kernel(%arg0: i32, %arg1: i32, %arg2: memref<1x12x128xbf16, #tpu.memory_space<vmem>>, %arg3: memref<32x36xbf16, #tpu.memory_space<vmem>>, %arg4: memref<1x128xf32, #tpu.memory_space<vmem>>, %arg5: memref<1x128xf32, #tpu.memory_space<vmem>>, %arg6: memref<1x32x128xbf16, #tpu.memory_space<vmem>>, %arg7: memref<32x128xf32, #tpu.memory_space<vmem>>) attributes {dimension_semantics = [#tpu.dimension_semantics<parallel>, #tpu.dimension_semantics<parallel>], iteration_bounds = array<i64: 2, 2>, scalar_prefetch = 0 : i64, scratch_operands = 0 : i64, tpu.core_type = #tpu.core_type<tc>, window_params = [{transform_indices = @transform_0, window_bounds = array<i64: 1, 12, 128>}, {pipeline_mode = #tpu.pipeline_mode<synchronous>, transform_indices = @transform_1, window_bounds = array<i64: 32, 36>}, {pipeline_mode = #tpu.pipeline_mode<synchronous>, transform_indices = @transform_2, window_bounds = array<i64: 1, 128>}, {pipeline_mode = #tpu.pipeline_mode<synchronous>, transform_indices = @transform_3, window_bounds = array<i64: 1, 128>}, {transform_indices = @transform_4, window_bounds = array<i64: 1, 32, 128>}, {transform_indices = @transform_5, window_bounds = array<i64: 32, 128>}]} {
    %c0 = arith.constant 0 : index
    %c0_0 = arith.constant 0 : index
    %c0_1 = arith.constant 0 : index
    %0 = vector.load %arg2[%c0, %c0_0, %c0_1] : memref<1x12x128xbf16, #tpu.memory_space<vmem>>, vector<1x12x128xbf16>
    %1 = vector.shape_cast %0 : vector<1x12x128xbf16> to vector<12x128xbf16>
    %c0_2 = arith.constant 0 : index
    %c0_3 = arith.constant 0 : index
    %2 = vector.load %arg3[%c0_2, %c0_3] : memref<32x36xbf16, #tpu.memory_space<vmem>>, vector<32x36xbf16>
    %3 = vector.extract_strided_slice %2 {offsets = [0, 0], sizes = [32, 12], strides = [1, 1]} : vector<32x36xbf16> to vector<32x12xbf16>
    %cst = arith.constant dense<0.000000e+00> : vector<32x128xf32>
    %4 = tpu.matmul %3, %1, %cst {dimension_numbers = #tpu.dot_dimension_numbers<[1], [0], [0], [1], [0, 0, 1, 1], [], []>} : vector<32x12xbf16>, vector<12x128xbf16>, vector<32x128xf32> -> vector<32x128xf32>
    %5 = vector.extract_strided_slice %2 {offsets = [0, 12], sizes = [32, 12], strides = [1, 1]} : vector<32x36xbf16> to vector<32x12xbf16>
    %cst_4 = arith.constant dense<0.000000e+00> : vector<32x128xf32>
    %6 = tpu.matmul %5, %1, %cst_4 {dimension_numbers = #tpu.dot_dimension_numbers<[1], [0], [0], [1], [0, 0, 1, 1], [], []>} : vector<32x12xbf16>, vector<12x128xbf16>, vector<32x128xf32> -> vector<32x128xf32>
    %7 = vector.extract_strided_slice %2 {offsets = [0, 24], sizes = [32, 12], strides = [1, 1]} : vector<32x36xbf16> to vector<32x12xbf16>
    %cst_5 = arith.constant dense<0.000000e+00> : vector<32x128xf32>
    %8 = tpu.matmul %7, %1, %cst_5 {dimension_numbers = #tpu.dot_dimension_numbers<[1], [0], [0], [1], [0, 0, 1, 1], [], []>} : vector<32x12xbf16>, vector<12x128xbf16>, vector<32x128xf32> -> vector<32x128xf32>
    %c0_6 = arith.constant 0 : index
    %c0_7 = arith.constant 0 : index
    %9 = vector.load %arg4[%c0_6, %c0_7] : memref<1x128xf32, #tpu.memory_space<vmem>>, vector<1x128xf32>
    %c1_i32 = arith.constant 1 : i32
    %10 = tpu.dynamic_rotate %4 by %c1_i32 dim 1 : vector<32x128xf32>, i32 -> vector<32x128xf32>
    %11 = vector.broadcast %9 : vector<1x128xf32> to vector<32x128xf32>
    %12 = arith.mulf %11, %10 : vector<32x128xf32>
    %13 = arith.addf %12, %6 : vector<32x128xf32>
    %c0_8 = arith.constant 0 : index
    %c0_9 = arith.constant 0 : index
    %14 = vector.load %arg5[%c0_8, %c0_9] : memref<1x128xf32, #tpu.memory_space<vmem>>, vector<1x128xf32>
    %c127_i32 = arith.constant 127 : i32
    %15 = tpu.dynamic_rotate %8 by %c127_i32 dim 1 : vector<32x128xf32>, i32 -> vector<32x128xf32>
    %16 = vector.broadcast %14 : vector<1x128xf32> to vector<32x128xf32>
    %17 = arith.mulf %16, %15 : vector<32x128xf32>
    %18 = arith.addf %13, %17 : vector<32x128xf32>
    %cst_10 = arith.constant dense<0.000000e+00> : vector<32xf32>
    %19 = vector.multi_reduction <add>, %18, %cst_10 [1] : vector<32x128xf32> to vector<32xf32>
    %20 = vector.shape_cast %19 : vector<32xf32> to vector<32x1xf32>
    %21 = arith.mulf %18, %18 : vector<32x128xf32>
    %cst_11 = arith.constant dense<0.000000e+00> : vector<32xf32>
    %22 = vector.multi_reduction <add>, %21, %cst_11 [1] : vector<32x128xf32> to vector<32xf32>
    %23 = vector.shape_cast %22 : vector<32xf32> to vector<32x1xf32>
    %cst_12 = arith.constant 0.000000e+00 : f32
    %24 = vector.broadcast %cst_12 : f32 to vector<32x126xf32>
    %25 = tpu.concatenate %20, %23, %24 in 1 : vector<32x1xf32>, vector<32x1xf32>, vector<32x126xf32> -> vector<32x128xf32>
    %c0_13 = arith.constant 0 : index
    %c0_14 = arith.constant 0 : index
    %26 = vector.load %arg7[%c0_13, %c0_14] : memref<32x128xf32, #tpu.memory_space<vmem>>, vector<32x128xf32>
    tpu.vector_store %arg7[%c0_13, %c0_14], %25 {strides = array<i32>} : memref<32x128xf32, #tpu.memory_space<vmem>>, vector<32x128xf32>,
    %27 = arith.truncf %18 : vector<32x128xf32> to vector<32x128xbf16>
    %c0_15 = arith.constant 0 : index
    %c0_16 = arith.constant 0 : index
    %c0_17 = arith.constant 0 : index
    %28 = vector.load %arg6[%c0_15, %c0_16, %c0_17] : memref<1x32x128xbf16, #tpu.memory_space<vmem>>, vector<1x32x128xbf16>
    %29 = vector.shape_cast %28 : vector<1x32x128xbf16> to vector<32x128xbf16>
    %30 = vector.shape_cast %27 : vector<32x128xbf16> to vector<1x32x128xbf16>
    tpu.vector_store %arg6[%c0_15, %c0_16, %c0_17], %30 {strides = array<i32>} : memref<1x32x128xbf16, #tpu.memory_space<vmem>>, vector<1x32x128xbf16>,
    return
  }
  func.func @transform_0(%arg0: i32, %arg1: i32) -> (i32, i32, i32) {
    %c0_i32 = arith.constant 0 : i32
    %c0_i32_0 = arith.constant 0 : i32
    return %arg0, %c0_i32, %arg1 : i32, i32, i32
  }
  func.func @transform_1(%arg0: i32, %arg1: i32) -> (i32, i32) {
    %c0_i32 = arith.constant 0 : i32
    %c0_i32_0 = arith.constant 0 : i32
    %c0_i32_1 = arith.constant 0 : i32
    return %c0_i32, %c0_i32_0 : i32, i32
  }
  func.func @transform_2(%arg0: i32, %arg1: i32) -> (i32, i32) {
    %c0_i32 = arith.constant 0 : i32
    %c0_i32_0 = arith.constant 0 : i32
    %c0_i32_1 = arith.constant 0 : i32
    return %c0_i32, %c0_i32_0 : i32, i32
  }
  func.func @transform_3(%arg0: i32, %arg1: i32) -> (i32, i32) {
    %c0_i32 = arith.constant 0 : i32
    %c0_i32_0 = arith.constant 0 : i32
    %c0_i32_1 = arith.constant 0 : i32
    return %c0_i32, %c0_i32_0 : i32, i32
  }
  func.func @transform_4(%arg0: i32, %arg1: i32) -> (i32, i32, i32) {
    %c0_i32 = arith.constant 0 : i32
    %c0_i32_0 = arith.constant 0 : i32
    return %arg0, %c0_i32, %arg1 : i32, i32, i32
  }
  func.func @transform_5(%arg0: i32, %arg1: i32) -> (i32, i32) {
    %c2_i32 = arith.constant 2 : i32
    %0 = arith.muli %arg0, %c2_i32 : i32
    %1 = arith.addi %0, %arg1 : i32
    %c0_i32 = arith.constant 0 : i32
    %c0_i32_0 = arith.constant 0 : i32
    return %c0_i32, %1 : i32, i32
  }
}

</mosaic_0001>

<bundles_post_ra>
// kernel: tpu_custom_call.1
= control target key start
LH: loop header
LB: loop body
LE: loop exit
PB: predicated region body
PF: predicated region fallthrough
CT: control target
= control target key end

     0   :  { %s1423_s0 = inlined_call_operand.vmem [shape: bf16[2,12,256], index: 0, kind: input, shape index: {}]   ;;  %s1424_s1 = inlined_call_operand.vmem [shape: bf16[32,36], index: 1, kind: input, shape index: {}]   ;;  %s1425_s2 = inlined_call_operand.vmem [shape: f32[1,128], index: 2, kind: input, shape index: {}]   ;;  %s1426_s3 = inlined_call_operand.vmem [shape: f32[1,128], index: 3, kind: input, shape index: {}]   ;;  %s1427_s4 = inlined_call_operand.hbm [shape: bf16[2,32,256], index: 4, kind: output, shape index: {0}]   ;;  %s1428_s5 = inlined_call_operand.hbm [shape: f32[32,512], index: 5, kind: output, shape index: {1}]  }
   0x1   :  { %1436 = sst [smem:[#allocation13_spill]] %s1423_s0 }
   0x2   :  { %1437 = sst [smem:[#allocation14_spill]] %s1424_s1 }
   0x3   :  { %1438 = sst [smem:[#allocation15_spill]] %s1425_s2 }
   0x4   :  { %1439 = sst [smem:[#allocation16_spill]] %s1426_s3 }
   0x5   :  { %1440 = sst [smem:[#allocation17_spill]] %s1427_s4 }
   0x6   :  { %1441 = sst [smem:[#allocation18_spill]] %s1428_s5 }
   0x7   :  { %11 = vsyncpa [#allocation4], 0 }
   0x8   :  { %13 = vsyncpa [#allocation4 + $0x1], 0 }
   0x9   :  { %14 = vsyncpa [#allocation6], 0 }
   0xa   :  { %16 = vsyncpa [#allocation6 + $0x1], 0  ;;  %s1143_s18 = smov 0   ;;  %s1145_s19 = smov 0  }
   0xb   :  { %s1147_s20 = smov 0   ;;  %s1149_s21 = smov 0  }
   0xc   :  { %s1151_s22 = smov 0   ;;  %s1153_s23 = smov 0  }
   0xd   :  { %s1155_s24 = smov 0   ;;  %s1157_s25 = smov 0  }
   0xe   :  { %s1159_s26 = smov 0   ;;  %s1161_s27 = smov 0  }
   0xf   :  { %s1163_s28 = smov 0  }
  0x10 LB: > { %1442 = sst [smem:[#allocation9_spill]] %s1072_s21  ;;  %s757_s29 = sadd.s32 4294967295, %s1100_s28   ;;  %s1100_s28 = sphi %s1163_s28, %s22_s28   ;;  %s1096_s27 = sphi %s1161_s27, %s1473_s27   ;;  %s1092_s26 = sphi %s1159_s26, %s1472_s26   ;;  %s1088_s25 = sphi %s1157_s25, %s1471_s25   ;;  %s1084_s24 = sphi %s1155_s24, %s1470_s24   ;;  %s1080_s23 = sphi %s1153_s23, %s1469_s23   ;;  %s1076_s22 = sphi %s1151_s22, %s1468_s22   ;;  %s1072_s21 = sphi %s1149_s21, %s1467_s21   ;;  %s1068_s20 = sphi %s1147_s20, %s1466_s20   ;;  %s1064_s19 = sphi %s1145_s19, %s1465_s19   ;;  %s1060_s18 = sphi %s1143_s18, %s1464_s18  }
  0x11   : > { %1443 = sst [smem:[#allocation10_spill]] %s1084_s24  ;;  %s758_s30 = sadd.s32 4294967294, %s1100_s28  }
  0x12   : > { %s31_s6 = sadd.s32 1, %s1092_s26  ;;  %s34_s7 = sadd.s32 1, %s1096_s27 }
  0x13   : > { %p32_p0 = scmp.ge.s32.totalorder %s31_s6, 2  ;;  %s43_s8 = sadd.s32 1, %s1080_s23 }
  0x14   : > { %p50_p1 = scmp.ne.s32.totalorder %s1080_s23, %s1076_s22  ;;  %p51_p2 = scmp.eq.s32.totalorder %s1100_s28, 0 }
  0x15   : > { %s1475_s6 = smov (%p32_p0, %s31_s6), 0  ;;  %s1477_s7 = smov (!%p32_p0, %s34_s7), %s1096_s27 }
  0x16   : > { %s39_s9 = ssub.s32 %s1092_s26, %s1475_s6  ;;  %p1211_p3 = por %p51_p2, %p50_p1 }
  0x17   : > { %p36_p4 = scmp.ge.s32.totalorder %s1477_s7, 2  ;;  %p1215_p5 = scmp.eq.s32.totalorder %s757_s29, 3 }
  0x18   : > { %p150_p6 = scmp.ne.s32.totalorder %s1076_s22, %s1072_s21  ;;  %p1221_p7 = scmp.eq.s32.totalorder %s758_s30, 3 }
  0x19   : > { %s1479_s7 = smov (%p36_p4, %s1477_s7), 0  ;;  %p1229_p8 = por %p1215_p5, %p50_p1 }
  0x1a   : > { %p1235_p9 = por %p1221_p7, %p150_p6  ;;  %s38_s15 = ssub.s32 %s1096_s27, %s1479_s7 }
  0x1b   : > { %s1447_s13 = scalar_select %p1229_p8, 1, 0 }
  0x1c   : > { %s1449_s14 = scalar_select %p1235_p9, 1, 0 }
  0x1d   : > { %1448 = sst [smem:[#allocation11_spill]] %s1447_s13  ;;  %s759_s16 = sshll.u32 %s1096_s27, 1 }
  0x1e   : > { %1450 = sst [smem:[#allocation12_spill]] %s1449_s14  ;;  %s40_s17 = sor.u32 %s39_s9, %s38_s15 }
  0x1f   : > { %s158_s29 = sadd.s32 %s1092_s26, %s759_s16  ;;  %p41_p10 = scmp.eq.s32.totalorder %s40_s17, 0 }
  0x20   : > { %s760_s30 = sshll.u32 %s1479_s7, 1  ;;  %s164_s5 = sadd.s32 1, %s1068_s20 }
  0x21   : > { %s160_s21 = sadd.s32 %s760_s30, %s1475_s6  ;;  %p174_p11 = scmp.ne.s32.totalorder %s1068_s20, %s1064_s19 }
  0x22   : > { %s1247_s4 = scalar_select %p41_p10, %s1080_s23, %s43_s8  }
  0x23   : > { %s161_s24 = ssub.s32 %s158_s29, %s160_s21  ;;  %p180_p13 = scmp.ne.s32.totalorder %s1064_s19, %s1060_s18 }
  0x24   : > { %p162_p12 = scmp.eq.s32.totalorder %s161_s24, 0  ;;  %p1255_p0 = por %p174_p11, %p1215_p5 }
  0x25   : > { %p1264_p1 = por %p180_p13, %p1221_p7  ;;  %p762_p2 = scmp.ge.s32.totalorder %s1100_s28, 4 }
  0x26   : > { %s1260_s14 = scalar_select %p162_p12, %s1068_s20, %s164_s5  }
  0x27   : > { %206 = sbr.rel (%p762_p2) target bundleno = 57 (0x39), region = 28 }
  0x2e   : > { %209 = sbr.rel (!%p1211_p3) target bundleno = 57 (0x39), region = 32  ;;  %s211_s21 = sand.u32 (%p1211_p3), 1, %s1080_s23  }
  0x2f   : > { %s764_s24 = sshll.u32 (%p1211_p3), %s1096_s27, 2  ;;  %s763_s8 = sshll.u32 (%p1211_p3), %s211_s21, 3 }
  0x30   : > { %s215_s11 = sadd.s32 (%p1211_p3), %s1092_s26, %s764_s24  ;;  %s1453_s0 = sld [smem:[#allocation13_spill]] (%p1211_p3) }
  0x31   : > { %s765_s5 = sshll.u32 (%p1211_p3), %s215_s11, 2  ;;  %s213_s17 = scalar_lea.vmem (%p1211_p3), [#allocation2], %s763_s8 }
  0x36   : > { %s217_s16 = scalar_lea.vmem %s1453_s0, %s765_s5 }
  0x37   : > { %v233_v0 = vld [vmem:[%s217_s16] sm:$0xf]  ;;  %v235_v1 = vld [vmem:[%s217_s16 + $0x8] sm:$0xf] }
  0x38   : > { %234 = vst [vmem:[%s213_s17] sm:$0xf] %v233_v0  ;;  %236 = vst [vmem:[%s213_s17 + $0x4] sm:$0xf] %v235_v1 }
  0x39 PF: > { %p766_p3 = scmp.ge.s32.totalorder %s1100_s28, 1  ;;  %p262_p4 = scmp.lt.s32.totalorder %s1100_s28, 5 }
  0x3b   : > { %p263_p5 = pnand %p766_p3, %p262_p4 }
  0x3c   : > { %s1454_s1 = sld [smem:[#allocation14_spill]] (!%p263_p5)  ;;  %s1283_s30 = sand.u32 (!%p263_p5), 1, %s1076_s22   ;;  %vm325_vm0 = vcmask (!%p263_p5), 97280   ;;  %vm332_vm1 = vcmask (!%p263_p5), 1045504  }
  0x3d   : > { %266 = sbr.rel (%p263_p5) target bundleno = 697 (0x2b9), region = 73  ;;  %s1102_s21 = smov (!%p263_p5), 104  }
  0x3e   : > { %s767_s11 = sshll.u32 (!%p263_p5), %s1283_s30, 3  ;;  %s1103_s15 = smov (!%p263_p5), 116  }
  0x3f   : > { %s271_s5 = scalar_lea.vmem (!%p263_p5), [#allocation2], %s767_s11  ;;  %s1104_s12 = smov (!%p263_p5), 1  }
  0x40   : > { %v949_v4 = vld [vmem:[%s271_s5] sm:$0x3f] (!%p263_p5)   ;;  %s1105_s16 = smov (!%p263_p5), 127   ;;  %s1455_s2 = sld [smem:[#allocation15_spill]] (!%p263_p5) }
  0x41   : > { %835 = vmatprep.subr.msk.bf16.mxu0 (!%p263_p5), %vm332_vm1, %v949_v4  ;;  %v334_v5 = vsel (!%p263_p5), %vm332_vm1, %v949_v4, 0  ;;  %836 = vmatprep.subr.msk.bf16.mxu1 (!%p263_p5), %vm332_vm1, %v949_v4  ;;  %s1456_s3 = sld [smem:[#allocation16_spill]] (!%p263_p5)  ;;  %s768_s24 = sshll.u32 (!%p263_p5), %s1283_s30, 4 }
  0x42   : > { %v947_v2 = vld [vmem:[%s1454_s1] sm:$0xff] (!%p263_p5)   ;;  %v948_v3 = vld [vmem:[%s1454_s1 + $0x8] sm:$0xff] (!%p263_p5)   ;;  %818 = vmatpush3.bf16.msra.mxu0 (!%p263_p5), %v334_v5  ;;  %824 = vmatpush3.bf16.msra.mxu1 (!%p263_p5), %v334_v5  ;;  %s293_s8 = scalar_lea.vmem (!%p263_p5), [#allocation3], %s768_s24  ;;  %s1457_s11 = sld [smem:[#allocation10_spill]] (!%p263_p5) }
  0x43   : > { %444 = vrot.lane.b32.xlu0 (!%p263_p5), %v947_v2, %s1102_s21  ;;  %819 = vmatprep.mubr.msk.bf16.mxu0 (!%p263_p5), %vm325_vm0, %v947_v2  ;;  %s604_s1 = scalar_lea.sflag (!%p263_p5), [#allocation4], %s1283_s30 }
  0x44   : > { %385 = vrot.lane.b32.xlu1 %v947_v2, %s1103_s15  ;;  %837 = vmatprep.subr.msk.bf16.mxu0 %vm332_vm1, %v949_v4 }
  0x45   : > { %820 = vmatmul.mubr.msk.bf16.vlgmr.msra.gmra.mrb[0].mxu0 %vm325_vm0, %v948_v3 }
  0x46   : > { %830 = vmatpush3.bf16.msra.mxu0 %v334_v5  ;;  %v779_v24 = vld [vmem:[%s1455_s2] ss:$0 sm:$0xff] }
  0x47   : > { %446 = vrot.lane.b32.xlu0 %v948_v3, %s1102_s21  ;;  %v780_v27 = vld [vmem:[%s1456_s3] ss:$0 sm:$0xff]  ;;  %s1459_s21 = sld [smem:[#allocation17_spill]] }
  0x48   : > { %387 = vrot.lane.b32.xlu1 %v948_v3, %s1103_s15  ;;  %s623_s15 = sshll.u32 %s293_s8, 4  ;;  %s1304_s15 = int_to_ptr.vmem [resolvable:$true] %s623_s15 }
  0x49   : > { %s950_s2 = scalar_lea.vmem %s1304_s15, 256 }
  0x4a   : > { %p951_p6 = scmp.ne.s32.totalorder %s1304_s15, %s950_s2 }
  0x4c   : > { %p952_p7 = pnand %p951_p6, %p1229_p8 }
  0x4d   : > { %s1460_s0 = smov %s1459_s21 }
  0x4e   : > { %p953_p10 = pneg %p952_p7 }
  0xb5   : > { %v445_v6 = vpop.permute.xlu0 %444 }
  0xb6   : > { %831 = vmatprep.mubr.msk.bf16.mxu0 %vm325_vm0, %v445_v6  ;;  %v386_v7 = vpop.permute.xlu1 %385 }
  0xb7   : > { %825 = vmatprep.mubr.msk.bf16.mxu1 %vm325_vm0, %v386_v7 }
  0xb9   : > { %v447_v8 = vpop.permute.xlu0 %446 }
  0xba   : > { %832 = vmatmul.mubr.msk.bf16.vlgmr.msra.gmra.mrb[4].mxu0 %vm325_vm0, %v447_v8  ;;  %v388_v9 = vpop.permute.xlu1 %387 }
  0xbb   : > { %826 = vmatmul.mubr.msk.bf16.vlgmr.msra.gmra.mrb[0].mxu1 %vm325_vm0, %v388_v9 }
 0x118   : > { %v821_v10 = vpop.f32.mrb[0].mxu0 }
 0x119   : > { %v370_v11 = vpop.f32.mrb[1].mxu0  ;;  %508 = vrot.lane.b32.xlu0 %v821_v10, %s1104_s12 }
 0x11a   : > { %v822_v12 = vpop.f32.mrb[2].mxu0 }
 0x11b   : > { %510 = vrot.lane.b32.xlu1 %v822_v12, %s1104_s12  ;;  %v373_v13 = vpop.f32.mrb[3].mxu0 }
 0x11d   : > { %504 = vrot.lane.b32.xlu0 %v370_v11, %s1104_s12 }
 0x11f   : > { %506 = vrot.lane.b32.xlu1 %v373_v13, %s1104_s12  ;;  %s787_s12 = sshll.u32 %s1088_s25, 3 }
 0x18b   : > { %v509_v22 = vpop.permute.xlu0 %508 }
 0x18c   : > { %v520_v31 = vmul.f32 %v779_v24, %v509_v22 }
 0x18d   : > { %v833_v14 = vpop.f32.mrb[4].mxu0  ;;  %v511_v23 = vpop.permute.xlu1 %510 }
 0x18e   : > { %v488_v15 = vpop.f32.mrb[5].mxu0  ;;  %v827_v17 = vpop.f32.mrb[0].mxu1  ;;  %v521_v34 = vmul.f32 %v779_v24, %v511_v23 }
 0x18f   : > { %527 = vrot.lane.b32.xlu0 %v488_v15, %s1105_s16  ;;  %v834_v16 = vpop.f32.mrb[6].mxu0  ;;  %v429_v19 = vpop.f32.mrb[1].mxu1  ;;  %v524_v39 = vadd.f32 %v827_v17, %v520_v31 }
 0x190   : > { %v491_v18 = vpop.f32.mrb[7].mxu0  ;;  %v828_v20 = vpop.f32.mrb[2].mxu1 }
 0x191   : > { %529 = vrot.lane.b32.xlu1 %v491_v18, %s1105_s16  ;;  %v432_v21 = vpop.f32.mrb[3].mxu1  ;;  %v505_v25 = vpop.permute.xlu0 %504  ;;  %v525_v44 = vadd.f32 %v828_v20, %v521_v34 }
 0x192   : > { %v507_v26 = vpop.permute.xlu1 %506  ;;  %v518_v28 = vmul.f32 %v779_v24, %v505_v25 }
 0x193   : > { %531 = vrot.lane.b32.xlu0 %v833_v14, %s1105_s16  ;;  %v519_v29 = vmul.f32 %v779_v24, %v507_v26 }
 0x194   : > { %v522_v35 = vadd.f32 %v518_v28, %v429_v19 }
 0x195   : > { %533 = vrot.lane.b32.xlu1 %v834_v16, %s1105_s16  ;;  %v523_v36 = vadd.f32 %v519_v29, %v432_v21  ;;  %s620_s16 = sadd.s32 %s1457_s11, %s787_s12 }
 0x196   : > { %s788_s17 = sshll.u32 %s620_s16, 6 }
 0x197   : > { %s1309_s24 = scalar_lea.hbm %s1459_s21, %s788_s17 }
 0x201   : > { %v528_v30 = vpop.permute.xlu0 %527 }
 0x202   : > { %v541_v32 = vmul.f32 %v780_v27, %v528_v30 }
 0x203   : > { %v530_v33 = vpop.permute.xlu1 %529 }
 0x204   : > { %v542_v37 = vmul.f32 %v780_v27, %v530_v33  ;;  %v545_v40 = vadd.f32 %v541_v32, %v522_v35 }
 0x205   : > { %v532_v38 = vpop.permute.xlu0 %531 }
 0x206   : > { %v546_v41 = vadd.f32 %v542_v37, %v523_v36  ;;  %v543_v42 = vmul.f32 %v780_v27, %v532_v38  ;;  %v557_v49 = vmul.f32 %v545_v40, %v545_v40 }
 0x207   : > { %v534_v43 = vpop.permute.xlu1 %533 }
 0x208   : > { %v800_v45 = vpack.c.bf16 %v546_v41, %v545_v40  ;;  %v547_v46 = vadd.f32 %v543_v42, %v524_v39  ;;  %v544_v47 = vmul.f32 %v780_v27, %v534_v43  ;;  %551 = vadd.xlane.f32.xlu1 %v546_v41  ;;  %v558_v52 = vmul.f32 %v546_v41, %v546_v41 }
 0x20a   : > { %801 = vst [vmem:[%s293_s8] sm:$0xff] %v800_v45   ;;  %v548_v48 = vadd.f32 %v544_v47, %v525_v44  ;;  %553 = vadd.xlane.f32.xlu0 %v547_v46  ;;  %v559_v51 = vmul.f32 %v547_v46, %v547_v46 }
 0x20c   : > { %v805_v50 = vpack.c.bf16 %v548_v48, %v547_v46  ;;  %561 = vadd.xlane.f32.xlu1 %v557_v49  ;;  %v560_v53 = vmul.f32 %v548_v48, %v548_v48 }
 0x20e   : > { %807 = vst [vmem:[%s293_s8 + $0x8] sm:$0xff] %v805_v50   ;;  %549 = vadd.xlane.f32.xlu0 %v545_v40  ;;  %s1106_s8 = smov [#allocation3]  }
 0x20f   : > { %s954_s3 = sshll.u32 %s1106_s8, 4  ;;  %s955_s3 = int_to_ptr.vmem [resolvable:$false] %s954_s3 }
 0x210   : > { %565 = vadd.xlane.f32.xlu1 %v559_v51  ;;  %s956_s12 = scalar_lea.vmem %s955_s3, 512  ;;  %p957_p11 = scmp.lt.s32.totalorder %s1304_s15, %s955_s3 }
 0x211   : > { %p958_p12 = scmp.lt.s32.totalorder %s956_s12, %s950_s2 }
 0x212   : > { %555 = vadd.xlane.f32.xlu0 %v548_v48 }
 0x213   : > { %p959_p13 = por %p958_p12, %p957_p11 }
 0x215   : > { %p960_p2 = pnand %p959_p13, %p953_p10 }
 0x216   : > { %563 = vadd.xlane.f32.xlu0 %v558_v52 }
 0x21a   : > { %567 = vadd.xlane.f32.xlu0 %v560_v53 }
 0x21b   : > { %963 = shalt.err (!%p960_p2)
}
 0x21c   : > { %s964_s16 = scalar_lea.hbm %s1309_s24, 256  ;;  %s968_s29 = scalar_lea.hbm %s1460_s0, 1024 }
 0x21d   : > { %p965_p3 = scmp.ne.s32.totalorder %s1309_s24, %s964_s16  ;;  %p969_p6 = scmp.lt.u32.totalorder %s1309_s24, %s1460_s0 }
 0x21e   : > { %p970_p7 = scmp.lt.u32.totalorder %s968_s29, %s964_s16  ;;  %p972_p11 = scmp.lt.u32.totalorder %s964_s16, %s1309_s24 }
 0x21f   : > { %p966_p4 = pnand %p965_p3, %p1229_p8 }
 0x220   : > { %p971_p10 = por %p970_p7, %p969_p6 }
 0x221   : > { %p967_p5 = pneg %p966_p4 }
 0x222   : > { %p973_p12 = por %p972_p11, %p971_p10 }
 0x224   : > { %p974_p13 = pnand %p973_p12, %p967_p5 }
 0x226   : > { %977 = shalt.err (!%p974_p13)
}
 0x227   : > { %s1107_s2 = smov 64   ;;  %s1108_s8 = smov 128   ;;  %vm569_vm2 = vcmask 7168   ;;  %vm574_vm3 = vcmask 15360  }
 0x228   : > { %s1109_s12 = smov 4   ;;  %s298_s17 = sand.u32 1, %s1064_s19  }
 0x229   : > { %838 = dma.vmem_to_hbm [thread:$0]  (%p1229_p8), %s1304_s15, 256, %s1309_s24, %s604_s1, %s1107_s2, %s1108_s8, %s1109_s12  }
 0x22a   : > { %s769_s16 = sshll.u32 %s298_s17, 5  ;;  %s789_s1 = sshll.u32 %s1088_s25, 1 }
 0x22b   : > { %s300_s5 = scalar_lea.vmem [#allocation5], %s769_s16  ;;  %s634_s30 = sadd.s32 %s1457_s11, %s789_s1 }
 0x22c   : > { %s640_s15 = sshll.u32 %s300_s5, 4  ;;  %s790_s24 = sshll.u32 %s634_s30, 7  ;;  %s1347_s15 = int_to_ptr.vmem [resolvable:$true] %s640_s15 }
 0x22d   : > { %s1461_s29 = sld [smem:[#allocation18_spill]]  ;;  %s1358_s11 = scalar_lea.sflag [#allocation6], %s298_s17 }
 0x22e   : > { %s978_s3 = scalar_lea.vmem %s1347_s15, 512  ;;  %s1110_s2 = smov [#allocation5]  }
 0x22f   : > { %p979_p8 = scmp.ne.s32.totalorder %s1347_s15, %s978_s3  ;;  %s982_s12 = sshll.u32 %s1110_s2, 4  ;;  %s983_s12 = int_to_ptr.vmem [resolvable:$false] %s982_s12 }
 0x230   : > { %s984_s16 = scalar_lea.vmem %s983_s12, 1024  ;;  %p985_p4 = scmp.lt.s32.totalorder %s1347_s15, %s983_s12 }
 0x231   : > { %p980_p2 = pnand %p979_p8, %p1255_p0  ;;  %p986_p5 = scmp.lt.s32.totalorder %s984_s16, %s978_s3 }
 0x233   : > { %s1352_s21 = scalar_lea.hbm %s1461_s29, %s790_s24  ;;  %p981_p3 = pneg %p980_p2 }
 0x234   : > { %p987_p6 = por %p986_p5, %p985_p4 }
 0x236   : > { %p988_p7 = pnand %p987_p6, %p981_p3 }
 0x295   : > { %v552_v54 = vpop.xlane.xlu1 %551 }
 0x297   : > { %v554_v55 = vpop.xlane.xlu0 %553 }
 0x299   : > { %v562_v56 = vpop.xlane.xlu1 %561 }
 0x29b   : > { %v550_v57 = vpop.xlane.xlu0 %549 }
 0x29c   : > { %v570_v58 = vsel %vm569_vm2, %v550_v57, %v562_v56 }
 0x29d   : > { %v575_v59 = vsel %vm574_vm3, %v570_v58, 0.0  ;;  %v566_v60 = vpop.xlane.xlu1 %565 }
 0x29e   : > { %579 = vst [vmem:[%s300_s5] sm:$0xff] %v575_v59  ;;  %v572_v61 = vsel %vm569_vm2, %v554_v55, %v566_v60 }
 0x29f   : > { %v577_v62 = vsel %vm574_vm3, %v572_v61, 0.0  ;;  %v556_v63 = vpop.xlane.xlu0 %555 }
 0x2a0   : > { %581 = vst [vmem:[%s300_s5 + $0x10] sm:$0xff] %v577_v62 }
 0x2a3   : > { %v564_v0 = vpop.xlane.xlu0 %563 }
 0x2a4   : > { %v571_v1 = vsel %vm569_vm2, %v552_v54, %v564_v0 }
 0x2a5   : > { %v576_v2 = vsel %vm574_vm3, %v571_v1, 0.0 }
 0x2a6   : > { %580 = vst [vmem:[%s300_s5 + $0x8] sm:$0xff] %v576_v2 }
 0x2a7   : > { %v568_v3 = vpop.xlane.xlu0 %567 }
 0x2a8   : > { %v573_v4 = vsel %vm569_vm2, %v556_v63, %v568_v3 }
 0x2a9   : > { %v578_v5 = vsel %vm574_vm3, %v573_v4, 0.0 }
 0x2aa   : > { %582 = vst [vmem:[%s300_s5 + $0x18] sm:$0xff] %v578_v5 }
 0x2ab   : > { %991 = shalt.err (!%p988_p7)
}
 0x2ac   : > { %s992_s17 = scalar_lea.hbm %s1352_s21, 512  ;;  %s996_s30 = scalar_lea.hbm %s1461_s29, 2048 }
 0x2ad   : > { %p993_p10 = scmp.ne.s32.totalorder %s1352_s21, %s992_s17  ;;  %p997_p13 = scmp.lt.u32.totalorder %s1352_s21, %s1461_s29 }
 0x2ae   : > { %p998_p8 = scmp.lt.u32.totalorder %s996_s30, %s992_s17  ;;  %p1000_p3 = scmp.lt.u32.totalorder %s992_s17, %s1352_s21 }
 0x2af   : > { %p994_p11 = pnand %p993_p10, %p1255_p0 }
 0x2b0   : > { %p999_p2 = por %p998_p8, %p997_p13 }
 0x2b1   : > { %p995_p12 = pneg %p994_p11 }
 0x2b2   : > { %p1001_p4 = por %p1000_p3, %p999_p2 }
 0x2b4   : > { %p1002_p5 = pnand %p1001_p4, %p995_p12 }
 0x2b6   : > { %1005 = shalt.err (!%p1002_p5)
}
 0x2b7   : > { %s1111_s10 = smov 512   ;;  %s1112_s3 = smov 8  }
 0x2b8   : > { %839 = dma.vmem_to_hbm [thread:$0]  (%p1255_p0), %s1347_s15, 512, %s1352_s21, %s1358_s11, %s1108_s8, %s1111_s10, %s1112_s3  }
 0x2b9 PF: > { %s1462_s2 = sld [smem:[#allocation9_spill]]  ;;  %p849_p6 = scmp.ge.s32.totalorder %s1100_s28, 2 }
 0x2bb   : > { %p843_p7 = pnand %p849_p6, %p1235_p9 }
 0x2bf   : > { %s655_s16 = sand.u32 1, %s1462_s2  }
 0x2c0   : > { %s656_s17 = scalar_lea.sflag [#allocation4], %s655_s16 }
 0x2c1   : > { %1051 = dma.done.wait (!%p843_p7), %s656_s17, 256  }
 0x2c2   : > { %1053 = vsyncadd (!%p843_p7), %s656_s17, 4294967040  ;;  %s664_s5 = sand.u32 1, %s1060_s18   ;;  %p846_p10 = pnand %p849_p6, %p1264_p1 }
 0x2c3   : > { %s665_s1 = scalar_lea.sflag [#allocation6], %s664_s5 }
 0x2c4   : > { %1055 = dma.done.wait (!%p846_p10), %s665_s1, 512  }
 0x2c5   : > { %1057 = vsyncadd (!%p846_p10), %s665_s1, 4294966784  ;;  %s22_s28 = sadd.s32 1, %s1100_s28   ;;  %s1464_s18 = smov %s1064_s19 }
 0x2c6   : > { %p19_p0 = scmp.ge.s32.totalorder %s22_s28, 6   ;;  %s1465_s19 = smov %s1068_s20 }
 0x2c7   : > { %s1466_s20 = smov %s1260_s14  ;;  %s1467_s21 = smov %s1076_s22 }
 0x2c8   : > { %s1468_s22 = smov %s1080_s23  ;;  %s1469_s23 = smov %s1247_s4 }
 0x2c9   : > { %s1470_s24 = smov %s1092_s26  ;;  %s1471_s25 = smov %s1096_s27 }
 0x2ca   : > { %s1472_s26 = smov %s1475_s6  ;;  %s1473_s27 = smov %s1479_s7 }
 0x2cb   :  { %21 = sbr.rel (!%p19_p0) target bundleno = 16 (0x10), region = 134 }
 0x2d2   :  { %670 = vsyncpa [#allocation4], 1 }
 0x2d3   :  { %672 = vsyncpa [#allocation4 + $0x1], 1 }
 0x2d4   :  { %673 = vsyncpa [#allocation6], 1 }
 0x2d5   :  { %675 = vsyncpa [#allocation6 + $0x1], 1 }

</bundles_post_ra>
